<compile_context>
chip_gen: v6e
topology: v6e:2x2x1
jax: 0.10.0
libtpu: 0.0.40
codegen_flags: <defaults>
</compile_context>

<pallas_src>
import functools

import numpy as np
import jax
import jax.numpy as jnp
from jax.experimental import pallas as pl
from jax.experimental.pallas import tpu as pltpu


def _round_up(v, m):
    return ((v + m - 1) // m) * m


_EDGE_TILE = 128  # lanes of edge scores produced per grid step


# ----------------------------------------------------------------------------
# Fused Pallas kernel: node stage once (pid==0), edge-MLP tile per grid step.
# ----------------------------------------------------------------------------
def _make_kernel(C, edge_tile, n_edges):
    four_c = 4 * C

    def kernel(at_ref, xt_ref, w1s_ref, br1_ref, w2s_ref, br2_ref,
               wm_ref, b1_ref, w2c_ref, b2_ref, gboth_ref,
               x2t_ref, score_ref, hsd_scr):
        f32 = jnp.float32

        # ---- node stage: conv1 -> relu -> conv2 -> per-node MLP halves ----
        @pl.when(pl.program_id(0) == 0)
        def _node_stage():
            at = at_ref[...]                                  # (Np, Np) A^T[src,dst]
            xt = xt_ref[...]                                  # (Cin_p, Np)
            agg1 = jnp.dot(xt, at, preferred_element_type=f32)
            # stacked conv1: [Wrel1^T | Wroot1^T] @ [agg1 ; xt]  (one matmul)
            x1 = jnp.dot(w1s_ref[...], jnp.concatenate([agg1, xt], axis=0),
                         preferred_element_type=f32) + br1_ref[...]
            x1 = jnp.maximum(x1, 0.0)                         # (C, Np)
            agg2 = jnp.dot(x1, at, preferred_element_type=f32)
            x2 = jnp.dot(w2s_ref[...], jnp.concatenate([agg2, x1], axis=0),
                         preferred_element_type=f32) + br2_ref[...]
            x2t_ref[...] = x2                                 # lane-dense node embeds
            # stacked edge-MLP first layer applied per node: (8C, C) @ (C, Np)
            hcat = jnp.dot(wm_ref[...], x2, preferred_element_type=f32)
            # lane-concat [h_src | h_dst] -> (4C, 2Np), kept in scratch for all
            # edge tiles (computed once, no recompute per tile).
            hsd_scr[...] = jnp.concatenate([hcat[:four_c], hcat[four_c:]], axis=1)

        # ---- edge stage: one fused gather matmul per edge tile ----
        h = jnp.dot(hsd_scr[...], gboth_ref[...],
                    preferred_element_type=f32) + b1_ref[...]   # (4C, TE)
        h = jnp.maximum(h, 0.0)
        # final 4C -> 1 linear as a sublane reduce (avoids an M=1 matmul)
        score = jnp.sum(h * w2c_ref[...], axis=0, keepdims=True) + b2_ref[0]
        # mask padded edge lanes so the full row never carries fake edges
        lane = (jax.lax.broadcasted_iota(jnp.int32, (1, edge_tile), 1)
                + pl.program_id(0) * edge_tile)
        score_ref[...] = jnp.where(lane < n_edges, score, jnp.float32(-1e30))

    return kernel


def _fused_forward_pallas(ops, *, C, n_pad, e_pad, cin_pad, n_edges):
    f32 = jnp.float32
    te = min(_EDGE_TILE, e_pad)
    (at, xt, w1s, br1, w2s, br2, wm, b1, w2c, b2, gboth) = ops

    const = lambda i: (0, 0)
    in_specs = [
        pl.BlockSpec(at.shape, const),                 # A^T         (fetched once)
        pl.BlockSpec(xt.shape, const),                 # X^T         (fetched once)
        pl.BlockSpec(w1s.shape, const),                # [Wrel1|Wroot1]^T
        pl.BlockSpec(br1.shape, const),
        pl.BlockSpec(w2s.shape, const),                # [Wrel2|Wroot2]^T
        pl.BlockSpec(br2.shape, const),
        pl.BlockSpec(wm.shape, const),                 # stacked MLP W1^T
        pl.BlockSpec(b1.shape, const),
        pl.BlockSpec(w2c.shape, const),
        pl.BlockSpec(memory_space=pltpu.MemorySpace.SMEM),   # scalar bias b2
        pl.BlockSpec((2 * n_pad, te), lambda i: (0, i)),      # [Grow;Gcol] tile
    ]
    out_specs = (pl.BlockSpec((C, n_pad), const),             # x2^T
                 pl.BlockSpec((1, te), lambda i: (0, i)))     # edge-score tile
    scratch_shapes = [pltpu.VMEM((4 * C, 2 * n_pad), f32)]    # [h_src|h_dst]

    # explicit scoped-VMEM budget sized from the actual per-step blocks,
    # capped at 64 MiB so the same config also fits v7x.
    block_bytes = sum(int(np.prod(a.shape)) * 4 for a in ops[:9])
    block_bytes += 2 * n_pad * te * 4                 # gboth tile
    block_bytes += (C * n_pad + te) * 4               # outputs
    block_bytes += 4 * C * 2 * n_pad * 4              # scratch
    vmem_limit = int(min(max(4 * block_bytes + (8 << 20), 32 << 20), 64 << 20))

    flops = 2 * (cin_pad * n_pad * n_pad              # X^T @ A^T
                 + C * 2 * cin_pad * n_pad            # fused conv1 matmul
                 + C * n_pad * n_pad                  # x1^T @ A^T
                 + C * 2 * C * n_pad                  # fused conv2 matmul
                 + 8 * C * C * n_pad                  # stacked MLP halves
                 + 4 * C * 2 * n_pad * e_pad          # fused one-hot gather
                 + 4 * C * e_pad)                     # final reduce
    bytes_accessed = int(sum(int(np.prod(a.shape)) * a.dtype.itemsize for a in ops)
                         + (C * n_pad + e_pad) * 4)

    return pl.pallas_call(
        _make_kernel(C, te, n_edges),
        out_shape=(jax.ShapeDtypeStruct((C, n_pad), f32),
                   jax.ShapeDtypeStruct((1, e_pad), f32)),
        grid=(e_pad // te,),
        in_specs=in_specs,
        out_specs=out_specs,
        scratch_shapes=scratch_shapes,
        compiler_params=pltpu.CompilerParams(
            # "arbitrary": later edge tiles depend on the pid==0 node stage
            # held in scratch.  TODO(synk): make parallel for v7x megacore.
            dimension_semantics=("arbitrary",),
            vmem_limit_bytes=vmem_limit),
        cost_estimate=pl.CostEstimate(flops=int(flops), transcendentals=0,
                                      bytes_accessed=bytes_accessed),
    )(*ops)


# ----------------------------------------------------------------------------
# Operand preparation (padding, transposition, weight stacking) — all f32,
# built directly in the kernel dtype (no separate cast materialization).
# ----------------------------------------------------------------------------
def _prepare_operands(params, x, edge_index, edge_attr, *, n_pad, e_pad, cin_pad):
    f32 = jnp.float32
    N, Cin = x.shape
    E = edge_attr.shape[0]
    row, col = edge_index[0], edge_index[1]

    wr1, br1, wo1 = params["conv1"]        # (Cin,C), (1,C), (Cin,C)
    wr2, br2, wo2 = params["conv2"]        # (C,C),  (1,C), (C,C)
    w1, b1, w2, b2 = params["mlp"]         # (2C,4C),(1,4C),(4C,1),(1,1)
    C = wr1.shape[1]

    # node features transposed: channels on sublanes, nodes on lanes
    xt = jnp.zeros((cin_pad, n_pad), f32).at[:Cin, :N].set(x.T.astype(f32))
    # transposed weighted adjacency: A^T[src,dst]=w so X^T @ A^T == (A @ X)^T
    at = jnp.zeros((n_pad, n_pad), f32).at[row, col].add(edge_attr.astype(f32))
    # stacked one-hot gather matrix [Grow; Gcol]: column e selects src/dst node
    eids = jnp.arange(E, dtype=jnp.int32)
    gboth = (jnp.zeros((2 * n_pad, e_pad), f32)
             .at[row, eids].set(1.0)
             .at[n_pad + col, eids].set(1.0))

    # fused conv weights: [Wrel^T | Wroot^T]
    w1s = (jnp.zeros((C, 2 * cin_pad), f32)
           .at[:, :Cin].set(wr1.T)
           .at[:, cin_pad:cin_pad + Cin].set(wo1.T))
    w2s = jnp.concatenate([wr2.T, wo2.T], axis=1).astype(f32)       # (C, 2C)
    # stacked edge-MLP first layer: rows 0..4C-1 -> src half, 4C..8C-1 -> dst half
    wm = jnp.concatenate([w1[:C].T, w1[C:].T], axis=0).astype(f32)  # (8C, C)

    return (at, xt, w1s, br1.T.astype(f32), w2s, br2.T.astype(f32),
            wm, b1.T.astype(f32), w2.astype(f32),
            b2.reshape((1,)).astype(f32), gboth)


# ----------------------------------------------------------------------------
# Plain-JAX reference (original PyTorch math: GraphConv x2 + edge MLP)
# ----------------------------------------------------------------------------
def _reference_forward(params, x, edge_index, edge_attr):
    wr1, br1, wo1 = params["conv1"]
    wr2, br2, wo2 = params["conv2"]
    w1, b1, w2, b2 = params["mlp"]
    row, col = edge_index[0], edge_index[1]
    agg1 = jnp.zeros_like(x).at[col].add(x[row] * edge_attr[:, None])
    x1 = jnp.maximum(agg1 @ wr1 + x @ wo1 + br1, 0.0)
    agg2 = jnp.zeros((x.shape[0], x1.shape[1]), x1.dtype).at[col].add(
        x1[row] * edge_attr[:, None])
    x2 = agg2 @ wr2 + x1 @ wo2 + br2
    edge_rep = jnp.concatenate([x2[row], x2[col]], axis=-1)
    h = jnp.maximum(edge_rep @ w1 + b1, 0.0)
    score = (h @ w2 + b2).reshape(-1)
    return x2, score


# ----------------------------------------------------------------------------
# Deterministic parameter init (shapes from CausalAttNet.__init__)
# ----------------------------------------------------------------------------
def _init_linear(key, fan_in, fan_out, bias=True):
    kw, kb = jax.random.split(key)
    bound = 1.0 / np.sqrt(fan_in)
    W = jax.random.uniform(kw, (fan_in, fan_out), jnp.float32, -bound, bound)
    if bias:
        b = jax.random.uniform(kb, (1, fan_out), jnp.float32, -bound, bound)
        return W, b
    return W, None


def init_params(key, in_channels=5, channels=8):
    keys = jax.random.split(key, 6)
    w_rel1, b_rel1 = _init_linear(keys[0], in_channels, channels)
    w_root1, _ = _init_linear(keys[1], in_channels, channels, bias=False)
    w_rel2, b_rel2 = _init_linear(keys[2], channels, channels)
    w_root2, _ = _init_linear(keys[3], channels, channels, bias=False)
    w1, b1 = _init_linear(keys[4], channels * 2, channels * 4)
    w2, b2 = _init_linear(keys[5], channels * 4, 1)
    return dict(conv1=(w_rel1, b_rel1, w_root1),
                conv2=(w_rel2, b_rel2, w_root2),
                mlp=(w1, b1, w2, b2))


# ----------------------------------------------------------------------------
# Device-side forward (jitted): one fused pallas_call
# ----------------------------------------------------------------------------
@functools.partial(jax.jit, static_argnames=("n_pad", "e_pad", "cin_pad"))
def embed_and_score(params, x, edge_index, edge_attr, *, n_pad, e_pad, cin_pad):
    N = x.shape[0]
    E = edge_attr.shape[0]
    C = params["conv1"][0].shape[1]
    ops = _prepare_operands(params, x, edge_index, edge_attr,
                            n_pad=n_pad, e_pad=e_pad, cin_pad=cin_pad)
    x2t, score_row = _fused_forward_pallas(ops, C=C, n_pad=n_pad, e_pad=e_pad,
                                           cin_pad=cin_pad, n_edges=E)
    return x2t[:, :N].T, score_row[0, :E]


# ----------------------------------------------------------------------------
# split_graph (device-side top-k) / relabel (host: dynamic shapes)
# ----------------------------------------------------------------------------
def split_graph(edge_index, edge_attr, edge_score, ratio):
    # TODO(synk): original split_graph does per-graph sparse top-k; a global
    # device-side top-k over all edges is used here.
    E = edge_score.shape[0]
    k = int(ratio * E)
    _, perm = jax.lax.top_k(edge_score, E)   # descending order, on device
    c_idx, o_idx = perm[:k], perm[k:]
    causal = (jnp.take(edge_index, c_idx, axis=1), jnp.take(edge_attr, c_idx),
              jnp.take(edge_score, c_idx))
    conf = (jnp.take(edge_index, o_idx, axis=1), jnp.take(edge_attr, o_idx),
            -jnp.take(edge_score, o_idx))
    return causal, conf


def relabel(x, edge_index, batch):
    # TODO(synk): np.unique has dynamic output shapes -> kept on host.
    sub_nodes = np.unique(edge_index)
    node_idx = np.full((x.shape[0],), -1, dtype=np.int64)
    node_idx[sub_nodes] = np.arange(sub_nodes.shape[0])
    return x[sub_nodes], node_idx[edge_index], batch[sub_nodes], None


def causal_att_net_forward(params, x, edge_index, edge_attr, batch, ratio):
    N, Cin = x.shape
    E = edge_attr.shape[0]
    n_pad = _round_up(N, 128)
    e_pad = _round_up(E, 128)
    cin_pad = _round_up(Cin, 8)

    x2, edge_score = embed_and_score(params, x, edge_index, edge_attr,
                                     n_pad=n_pad, e_pad=e_pad, cin_pad=cin_pad)
    (c_ei, c_ea, c_w), (o_ei, o_ea, o_w) = split_graph(edge_index, edge_attr,
                                                       edge_score, ratio)

    # host-side relabel (np.unique -> dynamic output shapes)
    x2_np = np.asarray(x2)
    b_np = np.asarray(batch)
    c_x, c_ei2, c_b, _ = relabel(x2_np, np.asarray(c_ei), b_np)
    o_x, o_ei2, o_b, _ = relabel(x2_np, np.asarray(o_ei), b_np)
    out = ((c_x, c_ei2, np.asarray(c_ea), np.asarray(c_w), c_b),
           (o_x, o_ei2, np.asarray(o_ea), np.asarray(o_w), o_b),
           edge_score)
    return out, x2, edge_score


# ----------------------------------------------------------------------------
if __name__ == "__main__":
    key = jax.random.PRNGKey(0)
    kx, ke, ka, kp = jax.random.split(key, 4)

    channels = 8          # args.channels
    in_channels = 5       # GraphConv(in_channels=5, ...)
    ratio = 0.5
    n_graphs, nodes_per_graph, edges_per_graph = 2, 64, 128
    N = n_graphs * nodes_per_graph          # 128 nodes  -> n_pad = 128
    E = n_graphs * edges_per_graph          # 256 edges  -> e_pad = 256 (2 edge tiles)

    x = jax.random.normal(kx, (N, in_channels), jnp.float32)
    base = jax.random.randint(ke, (2, E), 0, nodes_per_graph, dtype=jnp.int32)
    offsets = jnp.repeat(jnp.arange(n_graphs, dtype=jnp.int32) * nodes_per_graph,
                         edges_per_graph)
    edge_index = base + offsets[None, :]
    edge_attr = jax.random.uniform(ka, (E,), jnp.float32)
    batch = jnp.repeat(jnp.arange(n_graphs, dtype=jnp.int32), nodes_per_graph)

    params = init_params(kp, in_channels=in_channels, channels=channels)

    out, x2, edge_score = causal_att_net_forward(params, x, edge_index,
                                                 edge_attr, batch, ratio)
    jax.block_until_ready((x2, edge_score))

    # correctness: compare against the plain-JAX mirror of the original module
    with jax.default_matmul_precision("highest"):
        x2_ref, score_ref = _reference_forward(params, x, edge_index, edge_attr)
    np.testing.assert_allclose(np.asarray(x2), np.asarray(x2_ref),
                               rtol=2e-2, atol=2e-2)
    np.testing.assert_allclose(np.asarray(edge_score), np.asarray(score_ref),
                               rtol=2e-2, atol=2e-2)

    (causal, conf, score) = out
    assert x2.shape == (N, channels)
    assert edge_score.shape == (E,)
    assert causal[0].shape[1] == channels and conf[0].shape[1] == channels
    assert np.all(np.isfinite(np.asarray(edge_score)))
    print("KERNEL_OK")
</pallas_src>

<mosaic_0001>
module attributes {stable_mosaic.version = 11 : i64} {
  func.func private @main(%arg0: i32) attributes {dimension_semantics = [#tpu.dimension_semantics<core_parallel>], iteration_bounds = array<i64: 2>, tpu.core_type = #tpu.core_type<sc_scalar_subcore>, window_params = []} {
    return
  }
}

module attributes {stable_mosaic.version = 11 : i64} {
  func.func private @main(%arg0: i32) attributes {dimension_semantics = [#tpu.dimension_semantics<core_parallel>], iteration_bounds = array<i64: 2>, tpu.core_type = #tpu.core_type<sc_scalar_subcore>, window_params = []} {
    return
  }
}

module attributes {stable_mosaic.version = 11 : i64} {
  func.func @kernel(%arg0: i32, %arg1: memref<128x128xf32, #tpu.memory_space<vmem>>, %arg2: memref<8x128xf32, #tpu.memory_space<vmem>>, %arg3: memref<8x16xf32, #tpu.memory_space<vmem>>, %arg4: memref<8x1xf32, #tpu.memory_space<vmem>>, %arg5: memref<8x16xf32, #tpu.memory_space<vmem>>, %arg6: memref<8x1xf32, #tpu.memory_space<vmem>>, %arg7: memref<64x8xf32, #tpu.memory_space<vmem>>, %arg8: memref<32x1xf32, #tpu.memory_space<vmem>>, %arg9: memref<32x1xf32, #tpu.memory_space<vmem>>, %arg10: memref<1xf32, #tpu.memory_space<smem>>, %arg11: memref<256x128xf32, #tpu.memory_space<vmem>>, %arg12: memref<8x128xf32, #tpu.memory_space<vmem>>, %arg13: memref<1x128xf32, #tpu.memory_space<vmem>>, %arg14: memref<32x256xf32, #tpu.memory_space<vmem>>) attributes {dimension_semantics = [#tpu.dimension_semantics<arbitrary>], iteration_bounds = array<i64: 2>, scalar_prefetch = 0 : i64, scratch_operands = 1 : i64, tpu.core_type = #tpu.core_type<tc>, window_params = [{pipeline_mode = #tpu.pipeline_mode<synchronous>, transform_indices = @transform_0, window_bounds = array<i64: 128, 128>}, {pipeline_mode = #tpu.pipeline_mode<synchronous>, transform_indices = @transform_1, window_bounds = array<i64: 8, 128>}, {pipeline_mode = #tpu.pipeline_mode<synchronous>, transform_indices = @transform_2, window_bounds = array<i64: 8, 16>}, {pipeline_mode = #tpu.pipeline_mode<synchronous>, transform_indices = @transform_3, window_bounds = array<i64: 8, 1>}, {pipeline_mode = #tpu.pipeline_mode<synchronous>, transform_indices = @transform_4, window_bounds = array<i64: 8, 16>}, {pipeline_mode = #tpu.pipeline_mode<synchronous>, transform_indices = @transform_5, window_bounds = array<i64: 8, 1>}, {pipeline_mode = #tpu.pipeline_mode<synchronous>, transform_indices = @transform_6, window_bounds = array<i64: 64, 8>}, {pipeline_mode = #tpu.pipeline_mode<synchronous>, transform_indices = @transform_7, window_bounds = array<i64: 32, 1>}, {pipeline_mode = #tpu.pipeline_mode<synchronous>, transform_indices = @transform_8, window_bounds = array<i64: 32, 1>}, {transform_indices = @transform_9, window_bounds = array<i64: 1>}, {transform_indices = @transform_10, window_bounds = array<i64: 256, 128>}, {pipeline_mode = #tpu.pipeline_mode<synchronous>, transform_indices = @transform_11, window_bounds = array<i64: 8, 128>}, {transform_indices = @transform_12, window_bounds = array<i64: 1, 128>}]} {
    %c0_i32 = arith.constant 0 : i32
    %0 = arith.cmpi eq, %arg0, %c0_i32 : i32
    %1 = arith.extui %0 : i1 to i32
    %c0_i32_0 = arith.constant 0 : i32
    %2 = arith.cmpi ne, %1, %c0_i32_0 : i32
    scf.if %2 {
      %c0_14 = arith.constant 0 : index
      %c0_15 = arith.constant 0 : index
      %28 = vector.load %arg1[%c0_14, %c0_15] : memref<128x128xf32, #tpu.memory_space<vmem>>, vector<128x128xf32>
      %c0_16 = arith.constant 0 : index
      %c0_17 = arith.constant 0 : index
      %29 = vector.load %arg2[%c0_16, %c0_17] : memref<8x128xf32, #tpu.memory_space<vmem>>, vector<8x128xf32>
      %cst_18 = arith.constant dense<0.000000e+00> : vector<8x128xf32>
      %30 = tpu.matmul %29, %28, %cst_18 {dimension_numbers = #tpu.dot_dimension_numbers<[1], [0], [0], [1], [0, 0, 1, 1], [], []>} : vector<8x128xf32>, vector<128x128xf32>, vector<8x128xf32> -> vector<8x128xf32>
      %c0_19 = arith.constant 0 : index
      %c0_20 = arith.constant 0 : index
      %31 = vector.load %arg3[%c0_19, %c0_20] : memref<8x16xf32, #tpu.memory_space<vmem>>, vector<8x16xf32>
      %32 = tpu.concatenate %30, %29 in 0 : vector<8x128xf32>, vector<8x128xf32> -> vector<16x128xf32>
      %cst_21 = arith.constant dense<0.000000e+00> : vector<8x128xf32>
      %33 = tpu.matmul %31, %32, %cst_21 {dimension_numbers = #tpu.dot_dimension_numbers<[1], [0], [0], [1], [0, 0, 1, 1], [], []>} : vector<8x16xf32>, vector<16x128xf32>, vector<8x128xf32> -> vector<8x128xf32>
      %c0_22 = arith.constant 0 : index
      %c0_23 = arith.constant 0 : index
      %34 = vector.load %arg4[%c0_22, %c0_23] : memref<8x1xf32, #tpu.memory_space<vmem>>, vector<8x1xf32>
      %35 = vector.broadcast %34 : vector<8x1xf32> to vector<8x128xf32>
      %36 = arith.addf %33, %35 : vector<8x128xf32>
      %cst_24 = arith.constant 0.000000e+00 : f32
      %37 = vector.broadcast %cst_24 : f32 to vector<8x128xf32>
      %38 = arith.maximumf %36, %37 : vector<8x128xf32>
      %cst_25 = arith.constant dense<0.000000e+00> : vector<8x128xf32>
      %39 = tpu.matmul %38, %28, %cst_25 {dimension_numbers = #tpu.dot_dimension_numbers<[1], [0], [0], [1], [0, 0, 1, 1], [], []>} : vector<8x128xf32>, vector<128x128xf32>, vector<8x128xf32> -> vector<8x128xf32>
      %c0_26 = arith.constant 0 : index
      %c0_27 = arith.constant 0 : index
      %40 = vector.load %arg5[%c0_26, %c0_27] : memref<8x16xf32, #tpu.memory_space<vmem>>, vector<8x16xf32>
      %41 = tpu.concatenate %39, %38 in 0 : vector<8x128xf32>, vector<8x128xf32> -> vector<16x128xf32>
      %cst_28 = arith.constant dense<0.000000e+00> : vector<8x128xf32>
      %42 = tpu.matmul %40, %41, %cst_28 {dimension_numbers = #tpu.dot_dimension_numbers<[1], [0], [0], [1], [0, 0, 1, 1], [], []>} : vector<8x16xf32>, vector<16x128xf32>, vector<8x128xf32> -> vector<8x128xf32>
      %c0_29 = arith.constant 0 : index
      %c0_30 = arith.constant 0 : index
      %43 = vector.load %arg6[%c0_29, %c0_30] : memref<8x1xf32, #tpu.memory_space<vmem>>, vector<8x1xf32>
      %44 = vector.broadcast %43 : vector<8x1xf32> to vector<8x128xf32>
      %45 = arith.addf %42, %44 : vector<8x128xf32>
      %c0_31 = arith.constant 0 : index
      %c0_32 = arith.constant 0 : index
      %46 = vector.load %arg12[%c0_31, %c0_32] : memref<8x128xf32, #tpu.memory_space<vmem>>, vector<8x128xf32>
      tpu.vector_store %arg12[%c0_31, %c0_32], %45 {strides = array<i32>} : memref<8x128xf32, #tpu.memory_space<vmem>>, vector<8x128xf32>,
      %c0_33 = arith.constant 0 : index
      %c0_34 = arith.constant 0 : index
      %47 = vector.load %arg7[%c0_33, %c0_34] : memref<64x8xf32, #tpu.memory_space<vmem>>, vector<64x8xf32>
      %cst_35 = arith.constant dense<0.000000e+00> : vector<64x128xf32>
      %48 = tpu.matmul %47, %45, %cst_35 {dimension_numbers = #tpu.dot_dimension_numbers<[1], [0], [0], [1], [0, 0, 1, 1], [], []>} : vector<64x8xf32>, vector<8x128xf32>, vector<64x128xf32> -> vector<64x128xf32>
      %49 = vector.extract_strided_slice %48 {offsets = [0, 0], sizes = [32, 128], strides = [1, 1]} : vector<64x128xf32> to vector<32x128xf32>
      %50 = vector.extract_strided_slice %48 {offsets = [32, 0], sizes = [32, 128], strides = [1, 1]} : vector<64x128xf32> to vector<32x128xf32>
      %51 = tpu.concatenate %49, %50 in 1 : vector<32x128xf32>, vector<32x128xf32> -> vector<32x256xf32>
      %c0_36 = arith.constant 0 : index
      %c0_37 = arith.constant 0 : index
      %52 = vector.load %arg14[%c0_36, %c0_37] : memref<32x256xf32, #tpu.memory_space<vmem>>, vector<32x256xf32>
      tpu.vector_store %arg14[%c0_36, %c0_37], %51 {strides = array<i32>} : memref<32x256xf32, #tpu.memory_space<vmem>>, vector<32x256xf32>,
    } else {
    }
    %c0 = arith.constant 0 : index
    %c0_1 = arith.constant 0 : index
    %3 = vector.load %arg14[%c0, %c0_1] : memref<32x256xf32, #tpu.memory_space<vmem>>, vector<32x256xf32>
    %c0_2 = arith.constant 0 : index
    %c0_3 = arith.constant 0 : index
    %4 = vector.load %arg11[%c0_2, %c0_3] : memref<256x128xf32, #tpu.memory_space<vmem>>, vector<256x128xf32>
    %cst = arith.constant dense<0.000000e+00> : vector<32x128xf32>
    %5 = tpu.matmul %3, %4, %cst {dimension_numbers = #tpu.dot_dimension_numbers<[1], [0], [0], [1], [0, 0, 1, 1], [], []>} : vector<32x256xf32>, vector<256x128xf32>, vector<32x128xf32> -> vector<32x128xf32>
    %c0_4 = arith.constant 0 : index
    %c0_5 = arith.constant 0 : index
    %6 = vector.load %arg8[%c0_4, %c0_5] : memref<32x1xf32, #tpu.memory_space<vmem>>, vector<32x1xf32>
    %7 = vector.broadcast %6 : vector<32x1xf32> to vector<32x128xf32>
    %8 = arith.addf %5, %7 : vector<32x128xf32>
    %cst_6 = arith.constant 0.000000e+00 : f32
    %9 = vector.broadcast %cst_6 : f32 to vector<32x128xf32>
    %10 = arith.maximumf %8, %9 : vector<32x128xf32>
    %c0_7 = arith.constant 0 : index
    %c0_8 = arith.constant 0 : index
    %11 = vector.load %arg9[%c0_7, %c0_8] : memref<32x1xf32, #tpu.memory_space<vmem>>, vector<32x1xf32>
    %12 = vector.broadcast %11 : vector<32x1xf32> to vector<32x128xf32>
    %13 = arith.mulf %10, %12 : vector<32x128xf32>
    %cst_9 = arith.constant dense<0.000000e+00> : vector<128xf32>
    %14 = vector.multi_reduction <add>, %13, %cst_9 [0] : vector<32x128xf32> to vector<128xf32>
    %15 = vector.shape_cast %14 : vector<128xf32> to vector<1x128xf32>
    %c0_10 = arith.constant 0 : index
    %16 = memref.load %arg10[%c0_10] : memref<1xf32, #tpu.memory_space<smem>>
    %17 = vector.broadcast %16 : f32 to vector<1x128xf32>
    %18 = arith.addf %15, %17 : vector<1x128xf32>
    %19 = tpu.iota {dimensions = array<i32: 1>} : vector<1x128xi32>
    %c128_i32 = arith.constant 128 : i32
    %20 = arith.muli %arg0, %c128_i32 : i32
    %21 = vector.broadcast %20 : i32 to vector<1x128xi32>
    %22 = arith.addi %19, %21 : vector<1x128xi32>
    %c256_i32 = arith.constant 256 : i32
    %23 = vector.broadcast %c256_i32 : i32 to vector<1x128xi32>
    %24 = arith.cmpi slt, %22, %23 : vector<1x128xi32>
    %cst_11 = arith.constant -1.000000e+30 : f32
    %25 = vector.broadcast %cst_11 : f32 to vector<1x128xf32>
    %26 = arith.select %24, %18, %25 : vector<1x128xi1>, vector<1x128xf32>
    %c0_12 = arith.constant 0 : index
    %c0_13 = arith.constant 0 : index
    %27 = vector.load %arg13[%c0_12, %c0_13] : memref<1x128xf32, #tpu.memory_space<vmem>>, vector<1x128xf32>
    tpu.vector_store %arg13[%c0_12, %c0_13], %26 {strides = array<i32>} : memref<1x128xf32, #tpu.memory_space<vmem>>, vector<1x128xf32>,
    return
  }
  func.func @transform_0(%arg0: i32) -> (i32, i32) {
    %c0_i32 = arith.constant 0 : i32
    %c0_i32_0 = arith.constant 0 : i32
    %c0_i32_1 = arith.constant 0 : i32
    return %c0_i32, %c0_i32_0 : i32, i32
  }
  func.func @transform_1(%arg0: i32) -> (i32, i32) {
    %c0_i32 = arith.constant 0 : i32
    %c0_i32_0 = arith.constant 0 : i32
    %c0_i32_1 = arith.constant 0 : i32
    return %c0_i32, %c0_i32_0 : i32, i32
  }
  func.func @transform_2(%arg0: i32) -> (i32, i32) {
    %c0_i32 = arith.constant 0 : i32
    %c0_i32_0 = arith.constant 0 : i32
    %c0_i32_1 = arith.constant 0 : i32
    return %c0_i32, %c0_i32_0 : i32, i32
  }
  func.func @transform_3(%arg0: i32) -> (i32, i32) {
    %c0_i32 = arith.constant 0 : i32
    %c0_i32_0 = arith.constant 0 : i32
    %c0_i32_1 = arith.constant 0 : i32
    return %c0_i32, %c0_i32_0 : i32, i32
  }
  func.func @transform_4(%arg0: i32) -> (i32, i32) {
    %c0_i32 = arith.constant 0 : i32
    %c0_i32_0 = arith.constant 0 : i32
    %c0_i32_1 = arith.constant 0 : i32
    return %c0_i32, %c0_i32_0 : i32, i32
  }
  func.func @transform_5(%arg0: i32) -> (i32, i32) {
    %c0_i32 = arith.constant 0 : i32
    %c0_i32_0 = arith.constant 0 : i32
    %c0_i32_1 = arith.constant 0 : i32
    return %c0_i32, %c0_i32_0 : i32, i32
  }
  func.func @transform_6(%arg0: i32) -> (i32, i32) {
    %c0_i32 = arith.constant 0 : i32
    %c0_i32_0 = arith.constant 0 : i32
    %c0_i32_1 = arith.constant 0 : i32
    return %c0_i32, %c0_i32_0 : i32, i32
  }
  func.func @transform_7(%arg0: i32) -> (i32, i32) {
    %c0_i32 = arith.constant 0 : i32
    %c0_i32_0 = arith.constant 0 : i32
    %c0_i32_1 = arith.constant 0 : i32
    return %c0_i32, %c0_i32_0 : i32, i32
  }
  func.func @transform_8(%arg0: i32) -> (i32, i32) {
    %c0_i32 = arith.constant 0 : i32
    %c0_i32_0 = arith.constant 0 : i32
    %c0_i32_1 = arith.constant 0 : i32
    return %c0_i32, %c0_i32_0 : i32, i32
  }
  func.func @transform_9(%arg0: i32) -> i32 {
    %c0_i32 = arith.constant 0 : i32
    %c0_i32_0 = arith.constant 0 : i32
    return %c0_i32 : i32
  }
  func.func @transform_10(%arg0: i32) -> (i32, i32) {
    %c0_i32 = arith.constant 0 : i32
    %c0_i32_0 = arith.constant 0 : i32
    return %c0_i32, %arg0 : i32, i32
  }
  func.func @transform_11(%arg0: i32) -> (i32, i32) {
    %c0_i32 = arith.constant 0 : i32
    %c0_i32_0 = arith.constant 0 : i32
    %c0_i32_1 = arith.constant 0 : i32
    return %c0_i32, %c0_i32_0 : i32, i32
  }
  func.func @transform_12(%arg0: i32) -> (i32, i32) {
    %c0_i32 = arith.constant 0 : i32
    %c0_i32_0 = arith.constant 0 : i32
    return %c0_i32, %arg0 : i32, i32
  }
}

</mosaic_0001>

<bundles_post_ra>
// kernel: embed_and_score.1
= control target key start
LH: loop header
LB: loop body
LE: loop exit
PB: predicated region body
PF: predicated region fallthrough
CT: control target
= control target key end

     0   :  { %s2263_s0 = inlined_call_operand.hbm [shape: f32[128,128], index: 0, kind: input, shape index: {}]   ;;  %s2264_s1 = inlined_call_operand.vmem [shape: f32[8,128], index: 1, kind: input, shape index: {}]   ;;  %s2265_s2 = inlined_call_operand.vmem [shape: f32[8,16], index: 2, kind: input, shape index: {}]   ;;  %s2266_s3 = inlined_call_operand.vmem [shape: f32[8,1], index: 3, kind: input, shape index: {}]   ;;  %s2267_s4 = inlined_call_operand.vmem [shape: f32[8,16], index: 4, kind: input, shape index: {}]   ;;  %s2268_s5 = inlined_call_operand.vmem [shape: f32[8,1], index: 5, kind: input, shape index: {}]   ;;  %s2269_s6 = inlined_call_operand.vmem [shape: f32[64,8], index: 6, kind: input, shape index: {}]   ;;  %s2270_s7 = inlined_call_operand.vmem [shape: f32[32,1], index: 7, kind: input, shape index: {}]   ;;  %s2271_s8 = inlined_call_operand.vmem [shape: f32[32,1], index: 8, kind: input, shape index: {}]   ;;  %s2272_s9 = inlined_call_operand.<no memory space> [shape: f32[1], index: 9, kind: input, shape index: {}]   ;;  %s2273_s10 = inlined_call_operand.vmem [shape: f32[256,256], index: 10, kind: input, shape index: {}]   ;;  %s2274_s11 = inlined_call_operand.hbm [shape: f32[8,128], index: 11, kind: output, shape index: {0}]   ;;  %s2275_s12 = inlined_call_operand.hbm [shape: f32[1,256], index: 12, kind: output, shape index: {1}]  }
   0x1   :  { %18 = sst [smem:[#allocation3]] %s2272_s9 }
   0x2   :  { %19 = vsyncpa [#allocation5], 0 }
   0x3   :  { %20 = vsyncpa [#allocation6], 0 }
   0x4   :  { %21 = vsyncpa [#allocation10], 0 }
   0x5   :  { %23 = vsyncpa [#allocation10 + $0x1], 0  ;;  %s1880_s23 = smov 0   ;;  %s1882_s24 = smov 0  }
   0x6   :  { %s1884_s25 = smov 0   ;;  %s1886_s26 = smov 0  }
   0x7 LB: > { %s1901_s9 = sadd.s32 4294967295, %s1801_s26   ;;  %s1366_s27 = sadd.s32 4294967294, %s1801_s26   ;;  %s1801_s26 = sphi %s1886_s26, %s2296_s26   ;;  %s1797_s25 = sphi %s1884_s25, %s2300_s25   ;;  %s1793_s24 = sphi %s1882_s24, %s2299_s24   ;;  %s1789_s23 = sphi %s1880_s23, %s2298_s23  }
   0x8   : > { %s1905_s28 = sadd.s32 1, %s1801_s26   ;;  %s246_s29 = sadd.s32 1, %s1797_s25 }
   0x9   : > { %2281 = sst [smem:[#allocation14_spill]] %s1905_s28  ;;  %s243_s30 = ssub.s32 %s1801_s26, %s1905_s28 }
   0xa   : > { %p253_p0 = scmp.ne.s32.totalorder %s1797_s25, %s1793_s24  ;;  %p244_p1 = scmp.eq.s32.totalorder %s243_s30, 0 }
   0xb   : > { %p254_p2 = scmp.eq.s32.totalorder %s1801_s26, 0  ;;  %p2276_p3 = scmp.eq.s32.totalorder %s1901_s9, 1 }
   0xc   : > { %p309_p4 = scmp.ne.s32.totalorder %s1793_s24, %s1789_s23  ;;  %p310_p7 = scmp.eq.s32.totalorder %s1366_s27, 1 }
   0xd   : > { %s1917_s13 = scalar_select %p244_p1, %s1797_s25, %s246_s29  }
   0xe   : > { %p1919_p5 = por %p254_p2, %p253_p0  ;;  %p1925_p6 = por %p2276_p3, %p253_p0 }
   0xf   : > { %2282 = sst [smem:[#allocation15_spill]] %s1917_s13  ;;  %p1367_p8 = scmp.ge.s32.totalorder %s1801_s26, 1 }
  0x10   : > { %s2284_s15 = scalar_select %p1925_p6, 1, 0 }
  0x11   : > { %p317_p9 = scmp.lt.s32.totalorder %s1801_s26, 3  ;;  %p1932_p11 = por %p310_p7, %p309_p4 }
  0x12   : > { %p1635_p12 = scmp.eq.s32.totalorder %s1901_s9, 0  ;;  %s1803_s18 = smov [#allocation4]  }
  0x13   : > { %s2285_s16 = scalar_select %p1932_p11, 1, 0 }
  0x14   : > { %p1937_p13 = pnand %p1367_p8, %p317_p9  ;;  %s329_s19 = sshll.u32 %s1803_s18, 4  ;;  %s330_s19 = int_to_ptr.vmem [resolvable:$true] %s329_s19 }
  0x15   : > { %2286 = sst [smem:[#allocation16_spill]] %s2285_s16  ;;  %s1694_s20 = scalar_lea.vmem %s330_s19, 2048 }
  0x16   : > { %p1627_p0 = pneg %p1937_p13  ;;  %p1695_p3 = scmp.ne.s32.totalorder %s330_s19, %s1694_s20 }
  0x17   : > { %p1702_p10 = scmp.lt.s32.totalorder %s330_s19, %s330_s19  ;;  %p1703_p11 = scmp.lt.s32.totalorder %s1694_s20, %s1694_s20 }
  0x18   : > { %p1628_p1 = pnand %p1635_p12, %p1627_p0 }
  0x19   : > { %p1704_p6 = por %p1703_p11, %p1702_p10 }
  0x1a   : > { %p1685_p2 = pneg %p1628_p1 }
  0x1c   : > { %p1697_p4 = pnand %p1695_p3, %p1685_p2 }
  0x1e   : > { %p1698_p7 = pneg %p1697_p4 }
  0x20   : > { %p1705_p8 = pnand %p1704_p6, %p1698_p7 }
  0x22   : > { %1708 = shalt.err (!%p1705_p8)
}
  0x23   : > { %s1804_s21 = smov 128   ;;  %s1805_s22 = smov 8  }
  0x24   : > { %1630 = dma.hbm_to_vmem [thread:$0]  (!%p1628_p1), %s2263_s0, 2048, %s330_s19, [#allocation5], %s1804_s21, %s1804_s21, %s1805_s22  }
  0x25   : > { %p1369_p9 = scmp.ge.s32.totalorder %s1801_s26, 2 }
  0x27   : > { %366 = sbr.rel (%p1369_p9) target bundleno = 64 (0x40), region = 56 }
  0x2c   : > { %369 = sbr.rel (!%p1919_p5) target bundleno = 64 (0x40), region = 60  ;;  %s371_s30 = sand.u32 (%p1919_p5), 1, %s1797_s25  }
  0x2d   : > { %s1371_s18 = sshll.u32 (%p1919_p5), %s1801_s26, 3  ;;  %s1370_s20 = sshll.u32 (%p1919_p5), %s371_s30, 8 }
  0x2e   : > { %s1958_s16 = scalar_lea.vmem (%p1919_p5), %s2273_s10, %s1371_s18  ;;  %s1963_s14 = scalar_lea.vmem (%p1919_p5), [#allocation7], %s1370_s20 }
  0x2f   : > { %v466_v0 = vld [vmem:[%s1958_s16] sm:$0xff] (%p1919_p5)  ;;  %v468_v1 = vld [vmem:[%s1958_s16 + $0x10] sm:$0xff] (%p1919_p5) }
  0x30   : > { %v470_v2 = vld [vmem:[%s1958_s16 + $0x20] sm:$0xff] (%p1919_p5)  ;;  %467 = vst [vmem:[%s1963_s14] sm:$0xff] (%p1919_p5), %v466_v0  ;;  %469 = vst [vmem:[%s1963_s14 + $0x8] sm:$0xff] (%p1919_p5), %v468_v1  ;;  %v472_v3 = vld [vmem:[%s1958_s16 + $0x30] sm:$0xff] (%p1919_p5) }
  0x31   : > { %471 = vst [vmem:[%s1963_s14 + $0x10] sm:$0xff] %v470_v2  ;;  %v474_v4 = vld [vmem:[%s1958_s16 + $0x40] sm:$0xff]  ;;  %v476_v5 = vld [vmem:[%s1958_s16 + $0x50] sm:$0xff]  ;;  %473 = vst [vmem:[%s1963_s14 + $0x18] sm:$0xff] %v472_v3 }
  0x32   : > { %475 = vst [vmem:[%s1963_s14 + $0x20] sm:$0xff] %v474_v4  ;;  %477 = vst [vmem:[%s1963_s14 + $0x28] sm:$0xff] %v476_v5  ;;  %v478_v6 = vld [vmem:[%s1958_s16 + $0x60] sm:$0xff]  ;;  %v480_v7 = vld [vmem:[%s1958_s16 + $0x70] sm:$0xff] }
  0x33   : > { %v482_v8 = vld [vmem:[%s1958_s16 + $0x80] sm:$0xff]  ;;  %479 = vst [vmem:[%s1963_s14 + $0x30] sm:$0xff] %v478_v6  ;;  %481 = vst [vmem:[%s1963_s14 + $0x38] sm:$0xff] %v480_v7  ;;  %v484_v9 = vld [vmem:[%s1958_s16 + $0x90] sm:$0xff] }
  0x34   : > { %483 = vst [vmem:[%s1963_s14 + $0x40] sm:$0xff] %v482_v8  ;;  %v486_v10 = vld [vmem:[%s1958_s16 + $0xa0] sm:$0xff]  ;;  %v488_v11 = vld [vmem:[%s1958_s16 + $0xb0] sm:$0xff]  ;;  %485 = vst [vmem:[%s1963_s14 + $0x48] sm:$0xff] %v484_v9 }
  0x35   : > { %487 = vst [vmem:[%s1963_s14 + $0x50] sm:$0xff] %v486_v10  ;;  %489 = vst [vmem:[%s1963_s14 + $0x58] sm:$0xff] %v488_v11  ;;  %v490_v12 = vld [vmem:[%s1958_s16 + $0xc0] sm:$0xff]  ;;  %v492_v13 = vld [vmem:[%s1958_s16 + $0xd0] sm:$0xff] }
  0x36   : > { %v494_v14 = vld [vmem:[%s1958_s16 + $0xe0] sm:$0xff]  ;;  %491 = vst [vmem:[%s1963_s14 + $0x60] sm:$0xff] %v490_v12  ;;  %493 = vst [vmem:[%s1963_s14 + $0x68] sm:$0xff] %v492_v13  ;;  %v496_v15 = vld [vmem:[%s1958_s16 + $0xf0] sm:$0xff] }
  0x37   : > { %495 = vst [vmem:[%s1963_s14 + $0x70] sm:$0xff] %v494_v14  ;;  %v498_v16 = vld [vmem:[%s1958_s16 + $0x100] sm:$0xff]  ;;  %v500_v17 = vld [vmem:[%s1958_s16 + $0x110] sm:$0xff]  ;;  %497 = vst [vmem:[%s1963_s14 + $0x78] sm:$0xff] %v496_v15 }
  0x38   : > { %499 = vst [vmem:[%s1963_s14 + $0x80] sm:$0xff] %v498_v16  ;;  %501 = vst [vmem:[%s1963_s14 + $0x88] sm:$0xff] %v500_v17  ;;  %v502_v18 = vld [vmem:[%s1958_s16 + $0x120] sm:$0xff]  ;;  %v504_v19 = vld [vmem:[%s1958_s16 + $0x130] sm:$0xff] }
  0x39   : > { %v506_v20 = vld [vmem:[%s1958_s16 + $0x140] sm:$0xff]  ;;  %503 = vst [vmem:[%s1963_s14 + $0x90] sm:$0xff] %v502_v18  ;;  %505 = vst [vmem:[%s1963_s14 + $0x98] sm:$0xff] %v504_v19  ;;  %v508_v21 = vld [vmem:[%s1958_s16 + $0x150] sm:$0xff] }
  0x3a   : > { %507 = vst [vmem:[%s1963_s14 + $0xa0] sm:$0xff] %v506_v20  ;;  %v510_v22 = vld [vmem:[%s1958_s16 + $0x160] sm:$0xff]  ;;  %v512_v23 = vld [vmem:[%s1958_s16 + $0x170] sm:$0xff]  ;;  %509 = vst [vmem:[%s1963_s14 + $0xa8] sm:$0xff] %v508_v21 }
  0x3b   : > { %511 = vst [vmem:[%s1963_s14 + $0xb0] sm:$0xff] %v510_v22  ;;  %513 = vst [vmem:[%s1963_s14 + $0xb8] sm:$0xff] %v512_v23  ;;  %v514_v24 = vld [vmem:[%s1958_s16 + $0x180] sm:$0xff]  ;;  %v516_v25 = vld [vmem:[%s1958_s16 + $0x190] sm:$0xff] }
  0x3c   : > { %v518_v26 = vld [vmem:[%s1958_s16 + $0x1a0] sm:$0xff]  ;;  %515 = vst [vmem:[%s1963_s14 + $0xc0] sm:$0xff] %v514_v24  ;;  %517 = vst [vmem:[%s1963_s14 + $0xc8] sm:$0xff] %v516_v25  ;;  %v520_v27 = vld [vmem:[%s1958_s16 + $0x1b0] sm:$0xff] }
  0x3d   : > { %519 = vst [vmem:[%s1963_s14 + $0xd0] sm:$0xff] %v518_v26  ;;  %v522_v28 = vld [vmem:[%s1958_s16 + $0x1c0] sm:$0xff]  ;;  %v524_v29 = vld [vmem:[%s1958_s16 + $0x1d0] sm:$0xff]  ;;  %521 = vst [vmem:[%s1963_s14 + $0xd8] sm:$0xff] %v520_v27 }
  0x3e   : > { %523 = vst [vmem:[%s1963_s14 + $0xe0] sm:$0xff] %v522_v28  ;;  %525 = vst [vmem:[%s1963_s14 + $0xe8] sm:$0xff] %v524_v29  ;;  %v526_v30 = vld [vmem:[%s1958_s16 + $0x1e0] sm:$0xff]  ;;  %v528_v31 = vld [vmem:[%s1958_s16 + $0x1f0] sm:$0xff] }
  0x3f   : > { %527 = vst [vmem:[%s1963_s14 + $0xf0] sm:$0xff] %v526_v30  ;;  %529 = vst [vmem:[%s1963_s14 + $0xf8] sm:$0xff] %v528_v31 }
  0x40 PF: > { %538 = sbr.rel (%p1937_p13) target bundleno = 1372 (0x55c), region = 98 }
  0x45   : > { %1776 = dma.done.wait (%p1635_p12), [#allocation5], 2048  }
  0x46   : > { %1778 = vsyncadd (%p1635_p12), [#allocation5], 4294965248  ;;  %s2033_s28 = sand.u32 1, %s1793_s24   ;;  %p2288_p3 = scmp.ne.s32.totalorder %s1901_s9, 0 }
  0x47   : > { %s1374_s13 = sshll.u32 %s2033_s28, 8  ;;  %s584_s19 = scalar_lea.vmem [#allocation9], %s2033_s28 }
  0x48   : > { %s2036_s16 = scalar_lea.vmem [#allocation7], %s1374_s13  ;;  %588 = sbr.rel (%p2288_p3) target bundleno = 1092 (0x444), region = 110 }
  0x4d   : > { %v2041_v32 = vld [vmem:[#allocation4 + $0x78] sm:$0xff]  ;;  %v1806_v33 = vmov 0.0   ;;  %v2044_v34 = vld [vmem:[#allocation4 + $0x70] sm:$0xff]  ;;  %vm1807_vm0 = vmmov 0   ;;  %v2051_v35 = vld [vmem:[#allocation4 + $0x68] sm:$0xff]  ;;  %v1808_v51 = vmov 0  }
  0x4e   : > { %1485 = vmatprep.subr.mxu0 %v1806_v33  ;;  %1517 = vmatprep.mubr.msk.f32.mxu0 %vm1807_vm0, %v1806_v33  ;;  %v2057_v36 = vld [vmem:[#allocation4 + $0x60] sm:$0xff]  ;;  %v600_v38 = vld [vmem:[#allocation4 + $0x58] sm:$0xff]  ;;  %v599_v39 = vld [vmem:[#allocation4 + $0x50] sm:$0xff]  ;;  %vm683_vm1 = vcmask 130048   ;;  %vm917_vm2 = vcmask 64512  }
  0x4f   : > { %1486 = vmatpush3.msra.mxu0 %v2041_v32  ;;  %1520 = vmatprep.subr.mxu1 %v1806_v33  ;;  %v605_v37 = vld [vmem:[%s2264_s1] sm:$0xff]  ;;  %v598_v40 = vld [vmem:[#allocation4 + $0x48] sm:$0xff]  ;;  %v596_v42 = vld [vmem:[#allocation4 + $0x38] sm:$0xff] }
  0x50   : > { %1487 = vmatprep.subr.mxu0 %v1806_v33  ;;  %1524 = vmatprep.mubr.msk.f32.mxu1 %vm1807_vm0, %v1806_v33  ;;  %v597_v41 = vld [vmem:[#allocation4 + $0x40] sm:$0xff]  ;;  %v595_v43 = vld [vmem:[#allocation4 + $0x30] sm:$0xff]  ;;  %v594_v44 = vld [vmem:[#allocation4 + $0x28] sm:$0xff] }
  0x51   : > { %1488 = vmatpush3.msra.mxu0 %v2044_v34  ;;  %1521 = vmatpush3.msra.mxu1 %v605_v37  ;;  %v593_v45 = vld [vmem:[#allocation4 + $0x20] sm:$0xff]  ;;  %v592_v46 = vld [vmem:[#allocation4 + $0x18] sm:$0xff]  ;;  %v591_v47 = vld [vmem:[#allocation4 + $0x10] sm:$0xff] }
  0x52   : > { %1489 = vmatprep.subr.mxu0 %v1806_v33  ;;  %1522 = vmatprep.subr.mxu1 %v1806_v33  ;;  %v590_v48 = vld [vmem:[#allocation4 + $0x8] sm:$0xff]  ;;  %v589_v49 = vld [vmem:[#allocation4] sm:$0xff]  ;;  %v911_v8 = vld [vmem:[%s2269_s6 + $0x10] sm:$0xff] }
  0x53   : > { %1490 = vmatpush3.msra.mxu0 %v2051_v35  ;;  %v677_v50 = vld [vmem:[%s2266_s3] sm:$0xff]  ;;  %1680 = vset.pattern.permute.xlu0 %v1808_v51  ;;  %v910_v6 = vld [vmem:[%s2269_s6 + $0x8] sm:$0xff]  ;;  %v915_v9 = vld [vmem:[%s2269_s6 + $0x30] sm:$0xff] }
  0x54   : > { %1491 = vmatprep.subr.mxu0 %v1806_v33  ;;  %680 = vperm.xlu0 %1680, %v677_v50   ;;  %v829_v52 = vld [vmem:[%s2268_s5] sm:$0xff]  ;;  %v914_v7 = vld [vmem:[%s2269_s6 + $0x28] sm:$0xff]  ;;  %v912_v10 = vld [vmem:[%s2269_s6 + $0x18] sm:$0xff] }
  0x55   : > { %1492 = vmatpush3.msra.mxu0 %v2057_v36  ;;  %v676_v53 = vld [vmem:[%s2265_s2] sm:$0xff]  ;;  %v916_v11 = vld [vmem:[%s2269_s6 + $0x38] sm:$0xff] }
  0x56   : > { %1493 = vmatprep.subr.mxu0 %v1806_v33  ;;  %v828_v61 = vld [vmem:[%s2267_s4] sm:$0xff] }
  0x57   : > { %1494 = vmatpush3.msra.mxu0 %v600_v38  ;;  %v909_v0 = vld [vmem:[%s2269_s6] sm:$0xff] }
  0x58   : > { %1495 = vmatprep.subr.mxu0 %v1806_v33  ;;  %832 = vperm.xlu0 %1680, %v829_v52   ;;  %v913_v1 = vld [vmem:[%s2269_s6 + $0x20] sm:$0xff] }
  0x59   : > { %1496 = vmatpush3.msra.mxu0 %v599_v39 }
  0x5a   : > { %1497 = vmatprep.subr.mxu0 %v1806_v33 }
  0x5b   : > { %1498 = vmatpush3.msra.mxu0 %v598_v40 }
  0x5c   : > { %1499 = vmatprep.subr.mxu0 %v1806_v33 }
  0x5d   : > { %1500 = vmatpush3.msra.mxu0 %v597_v41 }
  0x5e   : > { %1501 = vmatprep.subr.mxu0 %v1806_v33 }
  0x5f   : > { %1502 = vmatpush3.msra.mxu0 %v596_v42 }
  0x60   : > { %1503 = vmatprep.subr.mxu0 %v1806_v33 }
  0x61   : > { %1504 = vmatpush3.msra.mxu0 %v595_v43 }
  0x62   : > { %1505 = vmatprep.subr.mxu0 %v1806_v33 }
  0x63   : > { %1506 = vmatpush3.msra.mxu0 %v594_v44 }
  0x64   : > { %1507 = vmatprep.subr.mxu0 %v1806_v33 }
  0x65   : > { %1508 = vmatpush3.msra.mxu0 %v593_v45 }
  0x66   : > { %1509 = vmatprep.subr.mxu0 %v1806_v33 }
  0x67   : > { %1510 = vmatpush3.msra.mxu0 %v592_v46 }
  0x68   : > { %1511 = vmatprep.subr.mxu0 %v1806_v33 }
  0x69   : > { %1512 = vmatpush3.msra.mxu0 %v591_v47 }
  0x6a   : > { %1513 = vmatprep.subr.mxu0 %v1806_v33 }
  0x6b   : > { %1514 = vmatpush3.msra.mxu0 %v590_v48 }
  0x6c   : > { %1515 = vmatprep.subr.mxu0 %v1806_v33 }
  0x6d   : > { %1516 = vmatpush3.msra.mxu0 %v589_v49 }
  0x6e   : > { %1518 = vmatmul.mubr.f32.vlgmr.msra.gmra.mxu0 %v605_v37  ;;  %1562 = vmatprep.subr.mxu0 %v1806_v33 }
  0x6f   : > { %1566 = vmatprep.mubr.msk.f32.mxu0 %vm1807_vm0, %v1806_v33 }
  0xcf   : > { %v681_v56 = vpop.permute.xlu0 %680 }
  0xd3   : > { %v833_v2 = vpop.permute.xlu0 %832 }
 0x12e   : > { %v672_v54 = vpop.f32.mrf.mxu0 }
 0x12f   : > { %1523 = vmatpush3.msra.mxu1 %v672_v54 }
 0x130   : > { %v1519_v55 = vpop.f32.mrf.mxu0  ;;  %1525 = vmatmul.mubr.msk.f32.vlgmr.msra.gmra.mxu1 %vm683_vm1, %v676_v53  ;;  %1527 = vmatprep.subr.mxu1 %v1806_v33 }
 0x131   : > { %1528 = vmatpush3.msra.mxu1 %v2041_v32  ;;  %1559 = vmatprep.mubr.msk.f32.mxu1 %vm1807_vm0, %v1806_v33 }
 0x132   : > { %1529 = vmatprep.subr.mxu1 %v1806_v33 }
 0x133   : > { %1530 = vmatpush3.msra.mxu1 %v2044_v34 }
 0x134   : > { %1531 = vmatprep.subr.mxu1 %v1806_v33 }
 0x135   : > { %1532 = vmatpush3.msra.mxu1 %v2051_v35 }
 0x136   : > { %1533 = vmatprep.subr.mxu1 %v1806_v33 }
 0x137   : > { %1534 = vmatpush3.msra.mxu1 %v2057_v36 }
 0x138   : > { %1535 = vmatprep.subr.mxu1 %v1806_v33 }
 0x139   : > { %1536 = vmatpush3.msra.mxu1 %v600_v38 }
 0x13a   : > { %1537 = vmatprep.subr.mxu1 %v1806_v33 }
 0x13b   : > { %1538 = vmatpush3.msra.mxu1 %v599_v39 }
 0x13c   : > { %1539 = vmatprep.subr.mxu1 %v1806_v33 }
 0x13d   : > { %1540 = vmatpush3.msra.mxu1 %v598_v40 }
 0x13e   : > { %1541 = vmatprep.subr.mxu1 %v1806_v33 }
 0x13f   : > { %1542 = vmatpush3.msra.mxu1 %v597_v41 }
 0x140   : > { %1543 = vmatprep.subr.mxu1 %v1806_v33 }
 0x141   : > { %1544 = vmatpush3.msra.mxu1 %v596_v42 }
 0x142   : > { %1545 = vmatprep.subr.mxu1 %v1806_v33 }
 0x143   : > { %1546 = vmatpush3.msra.mxu1 %v595_v43 }
 0x144   : > { %1547 = vmatprep.subr.mxu1 %v1806_v33 }
 0x145   : > { %1548 = vmatpush3.msra.mxu1 %v594_v44 }
 0x146   : > { %1549 = vmatprep.subr.mxu1 %v1806_v33 }
 0x147   : > { %1550 = vmatpush3.msra.mxu1 %v593_v45 }
 0x148   : > { %1551 = vmatprep.subr.mxu1 %v1806_v33 }
 0x149   : > { %1552 = vmatpush3.msra.mxu1 %v592_v46 }
 0x14a   : > { %1553 = vmatprep.subr.mxu1 %v1806_v33 }
 0x14b   : > { %1554 = vmatpush3.msra.mxu1 %v591_v47 }
 0x14c   : > { %1555 = vmatprep.subr.mxu1 %v1806_v33 }
 0x14d   : > { %1556 = vmatpush3.msra.mxu1 %v590_v48 }
 0x14e   : > { %1557 = vmatprep.subr.mxu1 %v1806_v33 }
 0x14f   : > { %1558 = vmatpush3.msra.mxu1 %v589_v49 }
 0x1f0   : > { %v753_v57 = vpop.f32.mrf.mxu1 }
 0x1f1   : > { %v754_v58 = vadd.f32 %v753_v57, %v681_v56 }
 0x1f2   : > { %v1526_v59 = vpop.f32.mrf.mxu1 }
 0x1f3   : > { %v757_v60 = vmax.f32 %v754_v58, 0.0 }
 0x1f5   : > { %1560 = vmatmul.mubr.f32.vlgmr.msra.gmra.mxu1 %v757_v60  ;;  %1563 = vmatpush3.msra.mxu0 %v757_v60 }
 0x1f6   : > { %1564 = vmatprep.subr.mxu0 %v1806_v33  ;;  %1577 = vmatprep.mubr.msk.f32.mxu1 %vm917_vm2, %v913_v1 }
 0x2b5   : > { %v824_v62 = vpop.f32.mrf.mxu1 }
 0x2b6   : > { %1565 = vmatpush3.msra.mxu0 %v824_v62 }
 0x2b7   : > { %v1561_v63 = vpop.f32.mrf.mxu1  ;;  %1567 = vmatmul.mubr.msk.f32.vlgmr.msra.gmra.mxu0 %vm683_vm1, %v828_v61 }
 0x2b8   : > { %1571 = vmatprep.mubr.msk.f32.mxu0 %vm917_vm2, %v909_v0 }
 0x377   : > { %v904_v3 = vpop.f32.mrf.mxu0 }
 0x378   : > { %v905_v4 = vadd.f32 %v904_v3, %v833_v2 }
 0x379   : > { %v1568_v5 = vpop.f32.mrf.mxu0 }
 0x37a   : > { %908 = vst [vmem:[#allocation8] sm:$0xff] %v905_v4  ;;  %1569 = vmatprep.subr.mxu0 %v905_v4  ;;  %1583 = vmatprep.subr.mxu1 %v905_v4 }
 0x37b   : > { %1570 = vmatpush3.msra.mxu0 %v905_v4  ;;  %1584 = vmatpush3.msra.mxu1 %v905_v4 }
 0x37c   : > { %1572 = vmatmul.mubr.msk.f32.vlgmr.msra.gmra.mxu0 %vm917_vm2, %v910_v6  ;;  %1578 = vmatmul.mubr.msk.f32.vlgmr.msra.gmra.mxu1 %vm917_vm2, %v914_v7 }
 0x37d   : > { %1574 = vmatprep.mubr.msk.f32.mxu0 %vm917_vm2, %v911_v8  ;;  %1580 = vmatprep.mubr.msk.f32.mxu1 %vm917_vm2, %v915_v9 }
 0x380   : > { %1575 = vmatmul.mubr.msk.f32.gmra.mxu0 %vm917_vm2, %v912_v10  ;;  %1581 = vmatmul.mubr.msk.f32.gmra.mxu1 %vm917_vm2, %v916_v11 }
 0x43c   : > { %v1573_v12 = vpop.f32.mrf.mxu0  ;;  %v1579_v13 = vpop.f32.mrf.mxu1 }
 0x43d   : > { %1049 = vst [vmem:[#allocation2 + $0x18] sm:$0xff] %v1573_v12  ;;  %1050 = vst [vmem:[#allocation2 + $0x10] sm:$0xff] %v1579_v13 }
 0x43e   : > { %v1008_v14 = vpop.f32.mrf.mxu0  ;;  %v1028_v15 = vpop.f32.mrf.mxu1 }
 0x43f   : > { %1047 = vst [vmem:[#allocation2 + $0x30] sm:$0xff] %v1008_v14  ;;  %1048 = vst [vmem:[#allocation2] sm:$0xff] %v1028_v15 }
 0x440   : > { %v1576_v16 = vpop.f32.mrf.mxu0  ;;  %v1582_v17 = vpop.f32.mrf.mxu1 }
 0x441   : > { %1053 = vst [vmem:[#allocation2 + $0x28] sm:$0xff] %v1576_v16  ;;  %1054 = vst [vmem:[#allocation2 + $0x38] sm:$0xff] %v1582_v17 }
 0x442   : > { %v1018_v18 = vpop.f32.mrf.mxu0  ;;  %v1038_v19 = vpop.f32.mrf.mxu1 }
 0x443   : > { %1051 = vst [vmem:[#allocation2 + $0x8] sm:$0xff] %v1018_v18  ;;  %1052 = vst [vmem:[#allocation2 + $0x20] sm:$0xff] %v1038_v19 }
 0x444 PF: > { %v1094_v20 = vld [vmem:[%s2036_s16 + $0xf8] sm:$0xff]  ;;  %v1093_v22 = vld [vmem:[%s2036_s16 + $0xf0] sm:$0xff]  ;;  %v1092_v24 = vld [vmem:[%s2036_s16 + $0xe8] sm:$0xff]  ;;  %v1809_v62 = vmov 0   ;;  %s1810_s17 = smov [#allocation8]   ;;  %p2289_p6 = scmp.eq.s32.totalorder %s1901_s9, 1 }
 0x445   : > { %v1078_v21 = vld [vmem:[%s2036_s16 + $0x78] sm:$0xff]  ;;  %1441 = vmatprep.subr.mxu0 %v1094_v20  ;;  %1585 = vmatprep.subr.mxu1 %v1094_v20  ;;  %v1077_v23 = vld [vmem:[%s2036_s16 + $0x70] sm:$0xff]  ;;  %v1076_v25 = vld [vmem:[%s2036_s16 + $0x68] sm:$0xff]  ;;  %s1267_s21 = sshll.u32 %s1810_s17, 4  ;;  %s1268_s21 = int_to_ptr.vmem [resolvable:$true] %s1267_s21 }
 0x446   : > { %1442 = vmatpush3.msra.mxu0 %v1078_v21  ;;  %1601 = vmatpush3.msra.mxu1 %v1078_v21  ;;  %v1091_v26 = vld [vmem:[%s2036_s16 + $0xe0] sm:$0xff]  ;;  %v1090_v28 = vld [vmem:[%s2036_s16 + $0xd8] sm:$0xff]  ;;  %v1089_v30 = vld [vmem:[%s2036_s16 + $0xd0] sm:$0xff]  ;;  %s1709_s22 = scalar_lea.vmem %s1268_s21, 128  ;;  %p1716_p12 = scmp.lt.s32.totalorder %s1268_s21, %s1268_s21 }
 0x447   : > { %1443 = vmatprep.subr.mxu0 %v1093_v22  ;;  %1586 = vmatprep.subr.mxu1 %v1093_v22  ;;  %v1075_v27 = vld [vmem:[%s2036_s16 + $0x60] sm:$0xff]  ;;  %v1074_v29 = vld [vmem:[%s2036_s16 + $0x58] sm:$0xff]  ;;  %v1073_v31 = vld [vmem:[%s2036_s16 + $0x50] sm:$0xff]  ;;  %p1710_p5 = scmp.ne.s32.totalorder %s1268_s21, %s1709_s22  ;;  %p1717_p13 = scmp.lt.s32.totalorder %s1709_s22, %s1709_s22 }
 0x448   : > { %1444 = vmatpush3.msra.mxu0 %v1077_v23  ;;  %1602 = vmatpush3.msra.mxu1 %v1077_v23  ;;  %v1088_v32 = vld [vmem:[%s2036_s16 + $0xc8] sm:$0xff]  ;;  %v1087_v34 = vld [vmem:[%s2036_s16 + $0xc0] sm:$0xff]  ;;  %v1086_v36 = vld [vmem:[%s2036_s16 + $0xb8] sm:$0xff] }
 0x449   : > { %1445 = vmatprep.subr.mxu0 %v1092_v24  ;;  %1587 = vmatprep.subr.mxu1 %v1092_v24  ;;  %v1072_v33 = vld [vmem:[%s2036_s16 + $0x48] sm:$0xff]  ;;  %v1071_v35 = vld [vmem:[%s2036_s16 + $0x40] sm:$0xff]  ;;  %v1070_v37 = vld [vmem:[%s2036_s16 + $0x38] sm:$0xff]  ;;  %p1711_p10 = pnand %p1710_p5, %p2289_p6  ;;  %p1718_p0 = por %p1717_p13, %p1716_p12 }
 0x44a   : > { %1446 = vmatpush3.msra.mxu0 %v1076_v25  ;;  %1603 = vmatpush3.msra.mxu1 %v1076_v25  ;;  %v1085_v38 = vld [vmem:[%s2036_s16 + $0xb0] sm:$0xff]  ;;  %v1084_v40 = vld [vmem:[%s2036_s16 + $0xa8] sm:$0xff]  ;;  %v1083_v42 = vld [vmem:[%s2036_s16 + $0xa0] sm:$0xff] }
 0x44b   : > { %1447 = vmatprep.subr.mxu0 %v1091_v26  ;;  %1588 = vmatprep.subr.mxu1 %v1091_v26  ;;  %v1069_v39 = vld [vmem:[%s2036_s16 + $0x30] sm:$0xff]  ;;  %v1068_v41 = vld [vmem:[%s2036_s16 + $0x28] sm:$0xff]  ;;  %v1067_v43 = vld [vmem:[%s2036_s16 + $0x20] sm:$0xff]  ;;  %p1712_p11 = pneg %p1711_p10 }
 0x44c   : > { %1448 = vmatpush3.msra.mxu0 %v1075_v27  ;;  %1604 = vmatpush3.msra.mxu1 %v1075_v27  ;;  %v1082_v44 = vld [vmem:[%s2036_s16 + $0x98] sm:$0xff]  ;;  %v1081_v46 = vld [vmem:[%s2036_s16 + $0x90] sm:$0xff]  ;;  %v1080_v48 = vld [vmem:[%s2036_s16 + $0x88] sm:$0xff] }
 0x44d   : > { %1449 = vmatprep.subr.mxu0 %v1090_v28  ;;  %1589 = vmatprep.subr.mxu1 %v1090_v28  ;;  %v1066_v45 = vld [vmem:[%s2036_s16 + $0x18] sm:$0xff]  ;;  %v1065_v47 = vld [vmem:[%s2036_s16 + $0x10] sm:$0xff]  ;;  %v1064_v49 = vld [vmem:[%s2036_s16 + $0x8] sm:$0xff]  ;;  %p1719_p1 = pnand %p1718_p0, %p1712_p11 }
 0x44e   : > { %1450 = vmatpush3.msra.mxu0 %v1074_v29  ;;  %1605 = vmatpush3.msra.mxu1 %v1074_v29  ;;  %v1079_v50 = vld [vmem:[%s2036_s16 + $0x80] sm:$0xff]  ;;  %v1055_v54 = vld [vmem:[#allocation2 + $0x30] sm:$0xff]  ;;  %v1059_v55 = vld [vmem:[#allocation2 + $0x8] sm:$0xff] }
 0x44f   : > { %1451 = vmatprep.subr.mxu0 %v1089_v30  ;;  %1590 = vmatprep.subr.mxu1 %v1089_v30  ;;  %v1063_v51 = vld [vmem:[%s2036_s16] sm:$0xff]  ;;  %v1058_v56 = vld [vmem:[#allocation2 + $0x10] sm:$0xff]  ;;  %v1062_v57 = vld [vmem:[#allocation2 + $0x38] sm:$0xff] }
 0x450   : > { %1452 = vmatpush3.msra.mxu0 %v1073_v31  ;;  %1606 = vmatpush3.msra.mxu1 %v1073_v31  ;;  %v1056_v52 = vld [vmem:[#allocation2] sm:$0xff]  ;;  %v1097_v59 = vld [vmem:[%s2270_s7 + $0x10] sm:$0xff]  ;;  %v1057_v60 = vld [vmem:[#allocation2 + $0x18] sm:$0xff] }
 0x451   : > { %1453 = vmatprep.subr.mxu0 %v1088_v32  ;;  %1591 = vmatprep.subr.mxu1 %v1088_v32  ;;  %v1060_v53 = vld [vmem:[#allocation2 + $0x20] sm:$0xff]  ;;  %v1061_v61 = vld [vmem:[#allocation2 + $0x28] sm:$0xff]  ;;  %v1098_v0 = vld [vmem:[%s2270_s7 + $0x18] sm:$0xff] }
 0x452   : > { %1454 = vmatpush3.msra.mxu0 %v1072_v33  ;;  %1607 = vmatpush3.msra.mxu1 %v1072_v33  ;;  %v1095_v58 = vld [vmem:[%s2270_s7] sm:$0xff]  ;;  %v1096_v63 = vld [vmem:[%s2270_s7 + $0x8] sm:$0xff]  ;;  %v1210_v3 = vld [vmem:[%s2271_s8 + $0x10] sm:$0xff] }
 0x453   : > { %1455 = vmatprep.subr.mxu0 %v1087_v34  ;;  %1592 = vmatprep.subr.mxu1 %v1087_v34  ;;  %v1208_v1 = vld [vmem:[%s2271_s8] sm:$0xff]  ;;  %v1209_v2 = vld [vmem:[%s2271_s8 + $0x8] sm:$0xff]  ;;  %v1211_v4 = vld [vmem:[%s2271_s8 + $0x18] sm:$0xff] }
 0x454   : > { %1456 = vmatpush3.msra.mxu0 %v1071_v35  ;;  %1608 = vmatpush3.msra.mxu1 %v1071_v35 }
 0x455   : > { %1457 = vmatprep.subr.mxu0 %v1086_v36  ;;  %1593 = vmatprep.subr.mxu1 %v1086_v36 }
 0x456   : > { %1458 = vmatpush3.msra.mxu0 %v1070_v37  ;;  %1609 = vmatpush3.msra.mxu1 %v1070_v37 }
 0x457   : > { %1459 = vmatprep.subr.mxu0 %v1085_v38  ;;  %1594 = vmatprep.subr.mxu1 %v1085_v38 }
 0x458   : > { %1460 = vmatpush3.msra.mxu0 %v1069_v39  ;;  %1610 = vmatpush3.msra.mxu1 %v1069_v39 }
 0x459   : > { %1461 = vmatprep.subr.mxu0 %v1084_v40  ;;  %1595 = vmatprep.subr.mxu1 %v1084_v40 }
 0x45a   : > { %1462 = vmatpush3.msra.mxu0 %v1068_v41  ;;  %1611 = vmatpush3.msra.mxu1 %v1068_v41 }
 0x45b   : > { %1463 = vmatprep.subr.mxu0 %v1083_v42  ;;  %1596 = vmatprep.subr.mxu1 %v1083_v42 }
 0x45c   : > { %1464 = vmatpush3.msra.mxu0 %v1067_v43  ;;  %1612 = vmatpush3.msra.mxu1 %v1067_v43 }
 0x45d   : > { %1465 = vmatprep.subr.mxu0 %v1082_v44  ;;  %1597 = vmatprep.subr.mxu1 %v1082_v44 }
 0x45e   : > { %1466 = vmatpush3.msra.mxu0 %v1066_v45  ;;  %1613 = vmatpush3.msra.mxu1 %v1066_v45 }
 0x45f   : > { %1467 = vmatprep.subr.mxu0 %v1081_v46  ;;  %1598 = vmatprep.subr.mxu1 %v1081_v46 }
 0x460   : > { %1468 = vmatpush3.msra.mxu0 %v1065_v47  ;;  %1614 = vmatpush3.msra.mxu1 %v1065_v47 }
 0x461   : > { %1469 = vmatprep.subr.mxu0 %v1080_v48  ;;  %1599 = vmatprep.subr.mxu1 %v1080_v48 }
 0x462   : > { %1470 = vmatpush3.msra.mxu0 %v1064_v49  ;;  %1615 = vmatpush3.msra.mxu1 %v1064_v49 }
 0x463   : > { %1471 = vmatprep.subr.mxu0 %v1079_v50  ;;  %1600 = vmatprep.subr.mxu1 %v1079_v50 }
 0x464   : > { %1472 = vmatpush3.msra.mxu0 %v1063_v51  ;;  %1616 = vmatpush3.msra.mxu1 %v1063_v51 }
 0x465   : > { %1183 = vmatprep.mubr.f32.mxu0 %v1056_v52  ;;  %1193 = vmatprep.mubr.f32.mxu1 %v1060_v53 }
 0x466   : > { %1184 = vmatmul.mubr.f32.vlgmr.msra.gmra.mxu0 %v1055_v54  ;;  %1194 = vmatmul.mubr.f32.vlgmr.msra.gmra.mxu1 %v1059_v55 }
 0x467   : > { %1188 = vmatprep.mubr.f32.mxu0 %v1058_v56  ;;  %1198 = vmatprep.mubr.f32.mxu1 %v1062_v57 }
 0x468   : > { %1681 = vset.pattern.permute.xlu0 %v1809_v62  ;;  %1682 = vset.pattern.permute.xlu1 %v1809_v62 }
 0x469   : > { %1101 = vperm.xlu0 %1681, %v1095_v58   ;;  %1111 = vperm.xlu1 %1682, %v1097_v59  }
 0x46a   : > { %1189 = vmatmul.mubr.f32.gmra.mxu0 %v1057_v60  ;;  %1199 = vmatmul.mubr.f32.gmra.mxu1 %v1061_v61 }
 0x46d   : > { %1106 = vperm.xlu0 %1681, %v1096_v63   ;;  %1116 = vperm.xlu1 %1682, %v1098_v0  }
 0x471   : > { %1214 = vperm.xlu0 %1681, %v1208_v1   ;;  %1219 = vperm.xlu1 %1682, %v1209_v2  }
 0x475   : > { %1224 = vperm.xlu0 %1681, %v1210_v3   ;;  %1229 = vperm.xlu1 %1682, %v1211_v4  }
 0x476   : > { %1722 = shalt.err (!%p1719_p1)
}
 0x477   : > { %p2290_p2 = pmov %p2289_p6  ;;  %v1248_v40 = vlaneseq  ;;  %s1245_s30 = sld [smem:[#allocation3]] }
 0x478   : > { %s1386_s18 = sshll.u32 %s1901_s9, 7  ;;  %s1388_s20 = sshll.u32 %s1901_s9, 4 }
 0x479   : > { %1622 = dma.vmem_to_hbm [thread:$0]  (%p2290_p2), %s1268_s21, 128, %s2274_s11, [#allocation6]   ;;  %v1249_v43 = vand.u32 127, %v1248_v40  ;;  %v1251_v45 = vstv %s1386_s18 }
 0x47a   : > { %s1280_s16 = sshll.u32 %s584_s19, 4  ;;  %s2220_s17 = scalar_lea.hbm %s2275_s12, %s1388_s20  ;;  %s1281_s16 = int_to_ptr.vmem [resolvable:$true] %s1280_s16 }
 0x47b   : > { %v1252_v47 = vadd.s32 %v1251_v45, %v1249_v43  ;;  %s1257_s21 = scalar_lea.sflag [#allocation10], %s2033_s28  ;;  %s1733_s22 = scalar_lea.vmem %s1281_s16, 16 }
 0x47c   : > { %p1734_p4 = scmp.ne.s32.totalorder %s1281_s16, %s1733_s22  ;;  %p2291_p7 = scmp.ne.s32.totalorder %s2284_s15, 0 }
 0x47d   : > { %v1246_v49 = vstv %s1245_s30  ;;  %vm1253_vm3 = vcmp.lt.s32.totalorder %v1252_v47, 256  ;;  %s1811_s27 = smov [#allocation9]  }
 0x47e   : > { %p1735_p8 = pnand %p1734_p4, %p2291_p7  ;;  %s1737_s29 = sshll.u32 %s1811_s27, 4  ;;  %s1738_s29 = int_to_ptr.vmem [resolvable:$false] %s1737_s29 }
 0x47f   : > { %s1739_s30 = scalar_lea.vmem %s1738_s29, 32  ;;  %p1740_p5 = scmp.lt.s32.totalorder %s1281_s16, %s1738_s29 }
 0x480   : > { %p1736_p3 = pneg %p1735_p8  ;;  %p1741_p6 = scmp.lt.s32.totalorder %s1739_s30, %s1733_s22 }
 0x482   : > { %p1742_p10 = por %p1741_p6, %p1740_p5 }
 0x484   : > { %p1743_p11 = pnand %p1742_p10, %p1736_p3 }
 0x4e4   : > { %v1102_v5 = vpop.permute.xlu0 %1101  ;;  %v1112_v6 = vpop.permute.xlu1 %1111 }
 0x4e8   : > { %v1107_v9 = vpop.permute.xlu0 %1106  ;;  %v1117_v12 = vpop.permute.xlu1 %1116 }
 0x4ec   : > { %v1215_v23 = vpop.permute.xlu0 %1214  ;;  %v1220_v27 = vpop.permute.xlu1 %1219 }
 0x4f0   : > { %v1225_v33 = vpop.permute.xlu0 %1224  ;;  %v1230_v36 = vpop.permute.xlu1 %1229 }
 0x526   : > { %v1473_v7 = vpop.f32.mrf.mxu0  ;;  %v1479_v8 = vpop.f32.mrf.mxu1 }
 0x528   : > { %v1474_v10 = vpop.f32.mrf.mxu0  ;;  %v1480_v11 = vpop.f32.mrf.mxu1 }
 0x529   : > { %v1475_v13 = vadd.f32 %v1474_v10, %v1473_v7  ;;  %v1481_v14 = vadd.f32 %v1480_v11, %v1479_v8 }
 0x52a   : > { %v1476_v15 = vpop.f32.mrf.mxu0  ;;  %v1482_v16 = vpop.f32.mrf.mxu1 }
 0x52b   : > { %v1186_v17 = vadd.f32 %v1475_v13, %v1102_v5  ;;  %v1196_v20 = vadd.f32 %v1481_v14, %v1112_v6 }
 0x52c   : > { %v1477_v18 = vpop.f32.mrf.mxu0  ;;  %v1483_v19 = vpop.f32.mrf.mxu1 }
 0x52d   : > { %v1478_v21 = vadd.f32 %v1477_v18, %v1476_v15  ;;  %v1484_v22 = vadd.f32 %v1483_v19, %v1482_v16  ;;  %v1204_v24 = vmax.f32 %v1186_v17, 0.0  ;;  %v1206_v28 = vmax.f32 %v1196_v20, 0.0 }
 0x52f   : > { %v1191_v25 = vadd.f32 %v1478_v21, %v1107_v9  ;;  %v1201_v26 = vadd.f32 %v1484_v22, %v1117_v12  ;;  %v1232_v30 = vmul.f32 %v1215_v23, %v1204_v24  ;;  %v1234_v34 = vmul.f32 %v1225_v33, %v1206_v28 }
 0x531   : > { %v1205_v29 = vmax.f32 %v1191_v25, 0.0  ;;  %v1207_v32 = vmax.f32 %v1201_v26, 0.0 }
 0x533   : > { %v1233_v31 = vmul.f32 %v1220_v27, %v1205_v29  ;;  %v1235_v37 = vmul.f32 %v1230_v36, %v1207_v32 }
 0x535   : > { %v1236_v35 = vadd.f32 %v1233_v31, %v1232_v30 }
 0x537   : > { %v1237_v38 = vadd.f32 %v1236_v35, %v1234_v34 }
 0x539   : > { %v1238_v39 = vadd.f32 %v1237_v38, %v1235_v37 }
 0x53b   : > { %v1239_v41 = vrot.slane %v1238_v39, 4 }
 0x53d   : > { %v1240_v42 = vadd.f32 %v1239_v41, %v1238_v39 }
 0x53f   : > { %v1241_v44 = vrot.slane %v1240_v42, 2 }
 0x541   : > { %v1242_v46 = vadd.f32 %v1241_v44, %v1240_v42 }
 0x543   : > { %v1243_v48 = vrot.slane %v1242_v46, 1 }
 0x545   : > { %v1244_v50 = vadd.f32 %v1243_v48, %v1242_v46 }
 0x547   : > { %v1247_v51 = vadd.f32 %v1246_v49, %v1244_v50 }
 0x549   : > { %v1254_v52 = vsel %vm1253_vm3, %v1247_v51, -1e+30 }
 0x54a   : > { %1255 = vst [vmem:[%s584_s19] sm:$0x1] %v1254_v52 }
 0x54b   : > { %1746 = shalt.err (!%p1743_p11)
}
 0x54c   : > { %s1747_s19 = scalar_lea.hbm %s2220_s17, 16  ;;  %s1751_s20 = scalar_lea.hbm %s2275_s12, 32 }
 0x54d   : > { %p1748_p12 = scmp.ne.s32.totalorder %s2220_s17, %s1747_s19  ;;  %p1752_p1 = scmp.lt.s32.totalorder %s2220_s17, %s2275_s12 }
 0x54e   : > { %p1753_p2 = scmp.lt.s32.totalorder %s1751_s20, %s1747_s19 }
 0x54f   : > { %p1749_p13 = pnand %p1748_p12, %p2291_p7 }
 0x550   : > { %p1754_p4 = por %p1753_p2, %p1752_p1 }
 0x551   : > { %p1750_p0 = pneg %p1749_p13 }
 0x553   : > { %p1755_p8 = pnand %p1754_p4, %p1750_p0 }
 0x555   : > { %1758 = shalt.err (!%p1755_p8)
}
 0x556   : > { %1623 = dma.vmem_to_hbm [thread:$0]  (%p2291_p7), %s1281_s16, 16, %s2220_s17, %s1257_s21  }
 0x557   : > { %p2292_p3 = scmp.eq.s32.totalorder %s1901_s9, 1 }
 0x559   : > { %1780 = dma.done.wait (%p2292_p3), [#allocation6], 128   ;;  %p2293_p5 = pmov %p2292_p3 }
 0x55b   : > { %1782 = vsyncadd (%p2293_p5), [#allocation6], 4294967168 }
 0x55c PF: > { %s2294_s22 = sld [smem:[#allocation16_spill]]  ;;  %s1296_s27 = sand.u32 1, %s1789_s23  }
 0x55d   : > { %s1297_s29 = scalar_lea.sflag [#allocation10], %s1296_s27 }
 0x562   : > { %p2295_p6 = scmp.ne.s32.totalorder %s2294_s22, 0 }
 0x564   : > { %p1632_p10 = pnand %p1369_p9, %p2295_p6 }
 0x566   : > { %p1633_p11 = pneg %p1632_p10 }
 0x568   : > { %1784 = dma.done.wait (%p1633_p11), %s1297_s29, 16  }
 0x569   : > { %1786 = vsyncadd (%p1633_p11), %s1297_s29, 4294967280  ;;  %s2296_s26 = sld [smem:[#allocation14_spill]]  ;;  %s2298_s23 = smov %s1793_s24 }
 0x56a   : > { %s2297_s15 = sld [smem:[#allocation15_spill]]  ;;  %s2299_s24 = smov %s1797_s25 }
 0x56f   : > { %p26_p7 = scmp.ge.s32.totalorder %s2296_s26, 4  }
 0x570   : > { %s2300_s25 = smov %s2297_s15 }
 0x571   :  { %28 = sbr.rel (!%p26_p7) target bundleno = 7 (0x7), region = 160 }
 0x576   :  { %1301 = vsyncpa [#allocation5], 1 }
 0x577   :  { %1303 = vsyncpa [#allocation5 + $0x1], 1 }
 0x578   :  { %1304 = vsyncpa [#allocation6], 1 }
 0x579   :  { %1306 = vsyncpa [#allocation6 + $0x1], 1 }
 0x57a   :  { %1307 = vsyncpa [#allocation10], 1 }
 0x57b   :  { %1309 = vsyncpa [#allocation10 + $0x1], 1 }

</bundles_post_ra>
